<compile_context>
chip_gen: v7x
topology: tpu7x:2x2x1
jax: 0.10.0
libtpu: 0.0.40
codegen_flags: <defaults>
</compile_context>

<pallas_src>
import math

import jax
import jax.numpy as jnp
import numpy as np
from jax.experimental import pallas as pl
from jax.experimental.pallas import tpu as pltpu


# ----------------------------- Pallas kernel ------------------------------ #

def _make_attention_pool_fc_kernel(B: int, S: int, E: int, num_heads: int):
    N = B * S
    H = num_heads
    assert E % H == 0, "embed_dim must be divisible by nr_heads"
    Dh = E // H
    scale = 1.0 / math.sqrt(Dh)

    def kernel(x_ref, wqkv_ref, bqkv_ref, sel_ref, mask_ref, pool_ref,
               wofc_ref, bofc_ref, out_ref):
        x = x_ref[...]                                              # (N, E)

        # Fused QKV projection: one MXU matmul.
        qkv = jnp.dot(x, wqkv_ref[...],
                      preferred_element_type=jnp.float32) + bqkv_ref[...]   # (N, 3E)
        q = qkv[:, :E]
        k = qkv[:, E:2 * E]
        v = qkv[:, 2 * E:]

        # Pack heads along lanes: Khat^T / Vhat are (H*N, E); row block h holds
        # K / V masked to head-h columns (sel is the precomputed 0/1 mask).
        sel = sel_ref[...]                                          # (H*N, E)
        khat_t = jnp.concatenate([k] * H, axis=0) * sel             # (H*N, E)
        vhat = jnp.concatenate([v] * H, axis=0) * sel               # (H*N, E)

        # All heads' scores in one lane-dense matmul (RHS contracted on dim 1).
        s = jax.lax.dot_general(q, khat_t, (((1,), (1,)), ((), ())),
                                preferred_element_type=jnp.float32)  # (N, H*N)
        s = s * scale + mask_ref[...]       # additive block-diag batch mask

        # Shift-invariant stabilization with the global row max (identical math
        # to per-head max; avoids a lane-segmented reduce, safe at these
        # score magnitudes).
        s = s - jnp.max(s, axis=-1, keepdims=True)
        p = jnp.exp(s)                                              # masked -> 0

        # Per-head denominators broadcast to the matching Dh output lanes via
        # the same sel matrix (one MXU matmul); normalization after the packed
        # P @ Vhat context matmul, divide moved to the EUP reciprocal.
        denom = jnp.dot(p, sel, preferred_element_type=jnp.float32)     # (N, E)
        ctx = jnp.dot(p, vhat, preferred_element_type=jnp.float32)      # (N, E)
        ctx = ctx * pl.reciprocal(denom, approx=True)

        # Mean-pool as an MXU matmul (sublane-padded pool matrix), then the
        # folded (out_proj @ fc) projection; single unmasked (8, 128) store.
        pooled = jnp.dot(pool_ref[...], ctx, preferred_element_type=jnp.float32)
        out_ref[...] = jnp.dot(pooled, wofc_ref[...],
                               preferred_element_type=jnp.float32) + bofc_ref[...]

    return kernel


# ---------------------- one-time constant preparation ---------------------- #

def prepare_attention_constants(params, B: int, S: int, num_heads: int):
    """Fuse weights and build all compile-time-constant matrices ONCE."""
    E = params["wq"].shape[0]
    O = params["wfc"].shape[1]
    H = num_heads
    assert E % H == 0, "embed_dim must be divisible by nr_heads"
    Dh = E // H
    N = B * S

    # Exact linear reassociations (hoisted out of the per-step path).
    wqkv = jnp.concatenate([params["wq"], params["wk"], params["wv"]], axis=1)
    bqkv = jnp.concatenate([params["bq"], params["bk"], params["bv"]], axis=1)
    wofc = params["wo"] @ params["wfc"]                              # (E, O)
    bofc = params["bo"] @ params["wfc"] + params["bfc"]              # (1, O)

    # Pad output lanes to 128 so the final store is lane-dense.
    O_pad = pl.cdiv(O, 128) * 128
    if O_pad > O:
        wofc = jnp.pad(wofc, ((0, 0), (0, O_pad - O)))
        bofc = jnp.pad(bofc, ((0, 0), (0, O_pad - O)))

    # Head-selection / denominator-scatter matrix (H*N, E).
    sel = (np.arange(H * N)[:, None] // N ==
           np.arange(E)[None, :] // Dh).astype(np.float32)

    # Additive block-diagonal batch mask, tiled across heads: (N, H*N).
    same = (np.arange(N)[:, None] // S) == (np.arange(N)[None, :] // S)
    mask = np.where(np.tile(same, (1, H)), 0.0, -1e30).astype(np.float32)

    # Mean-pool matrix padded to a multiple of 8 sublanes: (B_pad, N).
    B_pad = max(8, ((B + 7) // 8) * 8)
    pool = np.zeros((B_pad, N), np.float32)
    for r in range(B):
        pool[r, r * S:(r + 1) * S] = 1.0 / S

    return {
        "wqkv": wqkv, "bqkv": bqkv, "wofc": wofc, "bofc": bofc,
        "sel": jnp.asarray(sel), "mask": jnp.asarray(mask),
        "pool": jnp.asarray(pool),
        "O": O, "O_pad": O_pad, "B_pad": B_pad,
    }


def attention_pool_fc(tokens, prep, num_heads: int):
    """tokens: (B, S, E) f32 -> (B, O) f32 via MHA + mean-pool + Linear."""
    B, S, E = tokens.shape
    x_flat = tokens.reshape(B * S, E)                                # (N, E)

    out_padded = pl.pallas_call(
        _make_attention_pool_fc_kernel(B, S, E, num_heads),
        out_shape=jax.ShapeDtypeStruct((prep["B_pad"], prep["O_pad"]),
                                       jnp.float32),
        in_specs=[pl.BlockSpec(memory_space=pltpu.MemorySpace.VMEM)] * 8,
        out_specs=pl.BlockSpec(memory_space=pltpu.MemorySpace.VMEM),
    )(x_flat, prep["wqkv"], prep["bqkv"], prep["sel"], prep["mask"],
      prep["pool"], prep["wofc"], prep["bofc"])

    return out_padded[:B, :prep["O"]]


# ----------------------------- JAX-side glue ------------------------------ #

def embed_features(x, params, cat_idx, cont_idx):
    """FT-style tokenizer: (B, n_feat) -> (B, n_cat + n_cont, E)."""
    x_cat = x[:, jnp.array(cat_idx)].astype(jnp.int32)       # (B, n_cat)
    x_cont = x[:, jnp.array(cont_idx)].astype(jnp.float32)   # (B, n_cont)

    # categorical: per-feature embedding tables (n_cat, 50, E)
    cat_emb = jax.vmap(lambda tab, idx: tab[idx], in_axes=(0, 1), out_axes=1)(
        params["cat_tables"], x_cat)                          # (B, n_cat, E)

    # continuous: per-feature MLP  1 -> internal_dim -> E with ReLU
    h = jax.nn.relu(x_cont[..., None] * params["cont_w1"][None] +
                    params["cont_b1"][None])                  # (B, n_cont, I)
    cont_emb = jnp.einsum("bji,jie->bje", h, params["cont_w2"]) + \
        params["cont_b2"][None]                               # (B, n_cont, E)

    return jnp.concatenate([cat_emb, cont_emb], axis=1)


def product_tower_forward(x, params, prep, cat_idx, cont_idx, num_heads):
    tokens = embed_features(x, params, cat_idx, cont_idx)
    return attention_pool_fc(tokens, prep, num_heads)


# ------------------------ pure-JAX reference check ------------------------ #

def reference_forward(x, params, cat_idx, cont_idx, num_heads):
    tokens = embed_features(x, params, cat_idx, cont_idx)    # (B, S, E)
    B, S, E = tokens.shape
    H, Dh = num_heads, E // num_heads
    scale = 1.0 / math.sqrt(Dh)

    q = tokens @ params["wq"] + params["bq"]
    k = tokens @ params["wk"] + params["bk"]
    v = tokens @ params["wv"] + params["bv"]
    q = q.reshape(B, S, H, Dh).transpose(0, 2, 1, 3)
    k = k.reshape(B, S, H, Dh).transpose(0, 2, 1, 3)
    v = v.reshape(B, S, H, Dh).transpose(0, 2, 1, 3)
    s = jnp.einsum("bhqd,bhkd->bhqk", q, k) * scale
    p = jax.nn.softmax(s, axis=-1)
    ctx = jnp.einsum("bhqk,bhkd->bhqd", p, v).transpose(0, 2, 1, 3).reshape(B, S, E)
    attn = ctx @ params["wo"] + params["bo"]
    pooled = attn.mean(axis=1)
    return pooled @ params["wfc"] + params["bfc"]


# --------------------------------- main ----------------------------------- #

def init_params(key, n_cat, n_cont, embed_dim, internal_dim, output_dim):
    ks = jax.random.split(key, 16)
    E, I, O = embed_dim, internal_dim, output_dim
    p = {
        "cat_tables": 0.1 * jax.random.normal(ks[0], (n_cat, 50, E), jnp.float32),
        "cont_w1": 0.1 * jax.random.normal(ks[1], (n_cont, I), jnp.float32),
        "cont_b1": 0.1 * jax.random.normal(ks[2], (n_cont, I), jnp.float32),
        "cont_w2": 0.1 * jax.random.normal(ks[3], (n_cont, I, E), jnp.float32),
        "cont_b2": 0.1 * jax.random.normal(ks[4], (n_cont, E), jnp.float32),
        # attention in/out projections (already transposed: y = x @ W + b)
        "wq": 0.1 * jax.random.normal(ks[5], (E, E), jnp.float32),
        "bq": 0.1 * jax.random.normal(ks[6], (1, E), jnp.float32),
        "wk": 0.1 * jax.random.normal(ks[7], (E, E), jnp.float32),
        "bk": 0.1 * jax.random.normal(ks[8], (1, E), jnp.float32),
        "wv": 0.1 * jax.random.normal(ks[9], (E, E), jnp.float32),
        "bv": 0.1 * jax.random.normal(ks[10], (1, E), jnp.float32),
        "wo": 0.1 * jax.random.normal(ks[11], (E, E), jnp.float32),
        "bo": 0.1 * jax.random.normal(ks[12], (1, E), jnp.float32),
        # final fc
        "wfc": 0.1 * jax.random.normal(ks[13], (E, O), jnp.float32),
        "bfc": 0.1 * jax.random.normal(ks[14], (1, O), jnp.float32),
    }
    return p


if __name__ == "__main__":
    # Module hyper-parameters (small, consistent with the forward pass)
    cat_idx = [0, 1, 2]                  # 3 categorical features
    cont_idx = [3, 4, 5, 6, 7]           # 5 continuous features
    n_features = len(cat_idx) + len(cont_idx)   # 8
    seq_len = n_features                 # token count after the FT tokenizer
    embed_dim = 32
    output_dim = 8
    nr_heads = 4
    internal_dim = 16
    batch = 4

    key = jax.random.PRNGKey(0)
    k_param, k_cat, k_cont = jax.random.split(key, 3)
    params = init_params(k_param, len(cat_idx), len(cont_idx),
                         embed_dim, internal_dim, output_dim)

    # One-time preparation (weight fusions + constant matrices) — hot path
    # only runs the tokenizer glue and the single Pallas call, under one jit.
    prep = prepare_attention_constants(params, batch, seq_len, nr_heads)

    @jax.jit
    def forward(x):
        return product_tower_forward(x, params, prep, cat_idx, cont_idx, nr_heads)

    # Build input x: (batch, n_features) — categorical slots hold integer codes
    # in [0, 50), continuous slots hold floats (mirrors the .long()/.float() casts).
    x = jnp.zeros((batch, n_features), jnp.float32)
    cat_vals = jax.random.randint(k_cat, (batch, len(cat_idx)), 0, 50).astype(jnp.float32)
    cont_vals = jax.random.normal(k_cont, (batch, len(cont_idx)), jnp.float32)
    x = x.at[:, jnp.array(cat_idx)].set(cat_vals)
    x = x.at[:, jnp.array(cont_idx)].set(cont_vals)

    out = jax.block_until_ready(forward(x))

    ref = jax.block_until_ready(
        reference_forward(x, params, cat_idx, cont_idx, nr_heads))
    # Tolerance covers the exact-but-reassociated fusions (Wo@Wfc fold,
    # pool-as-matmul, global-max softmax shift) plus the EUP approx reciprocal.
    np.testing.assert_allclose(np.asarray(out), np.asarray(ref),
                               rtol=5e-3, atol=1e-4)

    print("KERNEL_OK")
</pallas_src>

<mosaic_0001>
module attributes {stable_mosaic.version = 11 : i64} {
  func.func @kernel(%arg0: memref<32x32xf32, #tpu.memory_space<vmem>>, %arg1: memref<32x96xf32, #tpu.memory_space<vmem>>, %arg2: memref<1x96xf32, #tpu.memory_space<vmem>>, %arg3: memref<128x32xf32, #tpu.memory_space<vmem>>, %arg4: memref<32x128xf32, #tpu.memory_space<vmem>>, %arg5: memref<8x32xf32, #tpu.memory_space<vmem>>, %arg6: memref<32x128xf32, #tpu.memory_space<vmem>>, %arg7: memref<1x128xf32, #tpu.memory_space<vmem>>, %arg8: memref<8x128xf32, #tpu.memory_space<vmem>>) attributes {dimension_semantics = [], scalar_prefetch = 0 : i64, scratch_operands = 0 : i64, tpu.core_type = #tpu.core_type<tc>} {
    %c0 = arith.constant 0 : index
    %c0_0 = arith.constant 0 : index
    %0 = vector.load %arg0[%c0, %c0_0] : memref<32x32xf32, #tpu.memory_space<vmem>>, vector<32x32xf32>
    %c0_1 = arith.constant 0 : index
    %c0_2 = arith.constant 0 : index
    %1 = vector.load %arg1[%c0_1, %c0_2] : memref<32x96xf32, #tpu.memory_space<vmem>>, vector<32x96xf32>
    %cst = arith.constant dense<0.000000e+00> : vector<32x96xf32>
    %2 = tpu.matmul %0, %1, %cst {dimension_numbers = #tpu.dot_dimension_numbers<[1], [0], [0], [1], [0, 0, 1, 1], [], []>} : vector<32x32xf32>, vector<32x96xf32>, vector<32x96xf32> -> vector<32x96xf32>
    %c0_3 = arith.constant 0 : index
    %c0_4 = arith.constant 0 : index
    %3 = vector.load %arg2[%c0_3, %c0_4] : memref<1x96xf32, #tpu.memory_space<vmem>>, vector<1x96xf32>
    %4 = vector.broadcast %3 : vector<1x96xf32> to vector<32x96xf32>
    %5 = arith.addf %2, %4 : vector<32x96xf32>
    %6 = vector.extract_strided_slice %5 {offsets = [0, 0], sizes = [32, 32], strides = [1, 1]} : vector<32x96xf32> to vector<32x32xf32>
    %7 = vector.extract_strided_slice %5 {offsets = [0, 32], sizes = [32, 32], strides = [1, 1]} : vector<32x96xf32> to vector<32x32xf32>
    %8 = vector.extract_strided_slice %5 {offsets = [0, 64], sizes = [32, 32], strides = [1, 1]} : vector<32x96xf32> to vector<32x32xf32>
    %c0_5 = arith.constant 0 : index
    %c0_6 = arith.constant 0 : index
    %9 = vector.load %arg3[%c0_5, %c0_6] : memref<128x32xf32, #tpu.memory_space<vmem>>, vector<128x32xf32>
    %10 = tpu.concatenate %7, %7, %7, %7 in 0 : vector<32x32xf32>, vector<32x32xf32>, vector<32x32xf32>, vector<32x32xf32> -> vector<128x32xf32>
    %11 = arith.mulf %10, %9 : vector<128x32xf32>
    %12 = tpu.concatenate %8, %8, %8, %8 in 0 : vector<32x32xf32>, vector<32x32xf32>, vector<32x32xf32>, vector<32x32xf32> -> vector<128x32xf32>
    %13 = arith.mulf %12, %9 : vector<128x32xf32>
    %cst_7 = arith.constant dense<0.000000e+00> : vector<32x128xf32>
    %14 = tpu.matmul %6, %11, %cst_7 {dimension_numbers = #tpu.dot_dimension_numbers<[1], [1], [0], [0], [0, 0, 1, 0], [], []>} : vector<32x32xf32>, vector<128x32xf32>, vector<32x128xf32> -> vector<32x128xf32>
    %cst_8 = arith.constant 0.353553385 : f32
    %15 = vector.broadcast %cst_8 : f32 to vector<32x128xf32>
    %16 = arith.mulf %14, %15 : vector<32x128xf32>
    %c0_9 = arith.constant 0 : index
    %c0_10 = arith.constant 0 : index
    %17 = vector.load %arg4[%c0_9, %c0_10] : memref<32x128xf32, #tpu.memory_space<vmem>>, vector<32x128xf32>
    %18 = arith.addf %16, %17 : vector<32x128xf32>
    %cst_11 = arith.constant dense<0xFF800000> : vector<32xf32>
    %19 = vector.multi_reduction <maximumf>, %18, %cst_11 [1] : vector<32x128xf32> to vector<32xf32>
    %20 = vector.shape_cast %19 : vector<32xf32> to vector<32x1xf32>
    %21 = vector.broadcast %20 : vector<32x1xf32> to vector<32x128xf32>
    %22 = arith.subf %18, %21 : vector<32x128xf32>
    %23 = math.exp %22 : vector<32x128xf32>
    %cst_12 = arith.constant dense<0.000000e+00> : vector<32x32xf32>
    %24 = tpu.matmul %23, %9, %cst_12 {dimension_numbers = #tpu.dot_dimension_numbers<[1], [0], [0], [1], [0, 0, 1, 1], [], []>} : vector<32x128xf32>, vector<128x32xf32>, vector<32x32xf32> -> vector<32x32xf32>
    %cst_13 = arith.constant dense<0.000000e+00> : vector<32x32xf32>
    %25 = tpu.matmul %23, %13, %cst_13 {dimension_numbers = #tpu.dot_dimension_numbers<[1], [0], [0], [1], [0, 0, 1, 1], [], []>} : vector<32x128xf32>, vector<128x32xf32>, vector<32x32xf32> -> vector<32x32xf32>
    %26 = tpu.reciprocal %24 {approx = true} : vector<32x32xf32> -> vector<32x32xf32>
    %27 = arith.mulf %25, %26 : vector<32x32xf32>
    %c0_14 = arith.constant 0 : index
    %c0_15 = arith.constant 0 : index
    %28 = vector.load %arg5[%c0_14, %c0_15] : memref<8x32xf32, #tpu.memory_space<vmem>>, vector<8x32xf32>
    %cst_16 = arith.constant dense<0.000000e+00> : vector<8x32xf32>
    %29 = tpu.matmul %28, %27, %cst_16 {dimension_numbers = #tpu.dot_dimension_numbers<[1], [0], [0], [1], [0, 0, 1, 1], [], []>} : vector<8x32xf32>, vector<32x32xf32>, vector<8x32xf32> -> vector<8x32xf32>
    %c0_17 = arith.constant 0 : index
    %c0_18 = arith.constant 0 : index
    %30 = vector.load %arg6[%c0_17, %c0_18] : memref<32x128xf32, #tpu.memory_space<vmem>>, vector<32x128xf32>
    %cst_19 = arith.constant dense<0.000000e+00> : vector<8x128xf32>
    %31 = tpu.matmul %29, %30, %cst_19 {dimension_numbers = #tpu.dot_dimension_numbers<[1], [0], [0], [1], [0, 0, 1, 1], [], []>} : vector<8x32xf32>, vector<32x128xf32>, vector<8x128xf32> -> vector<8x128xf32>
    %c0_20 = arith.constant 0 : index
    %c0_21 = arith.constant 0 : index
    %32 = vector.load %arg7[%c0_20, %c0_21] : memref<1x128xf32, #tpu.memory_space<vmem>>, vector<1x128xf32>
    %33 = vector.broadcast %32 : vector<1x128xf32> to vector<8x128xf32>
    %34 = arith.addf %31, %33 : vector<8x128xf32>
    %c0_22 = arith.constant 0 : index
    %c0_23 = arith.constant 0 : index
    %35 = vector.load %arg8[%c0_22, %c0_23] : memref<8x128xf32, #tpu.memory_space<vmem>>, vector<8x128xf32>
    tpu.vector_store %arg8[%c0_22, %c0_23], %34 {strides = array<i32>} : memref<8x128xf32, #tpu.memory_space<vmem>>, vector<8x128xf32>,
    return
  }
}

</mosaic_0001>

<bundles_post_ra>
// kernel: forward.1
= control target key start
LH: loop header
LB: loop body
LE: loop exit
PB: predicated region body
PF: predicated region fallthrough
CT: control target
= control target key end

     0   :  { %vm44_vm0 = vcmask 261120   ;;  %vm1410_vm2 = vmmov 0   ;;  %s1781_s1 = inlined_call_operand.vmem [shape: f32[32,96], index: 1, kind: input, shape index: {}]   ;;  %s1782_s0 = inlined_call_operand.vmem [shape: f32[32,32], index: 0, kind: input, shape index: {}]   ;;  %s1783_s3 = inlined_call_operand.vmem [shape: f32[128,32], index: 3, kind: input, shape index: {}]   ;;  %s1784_s2 = inlined_call_operand.vmem [shape: f32[1,96], index: 2, kind: input, shape index: {}]   ;;  %s1785_s4 = inlined_call_operand.vmem [shape: f32[32,128], index: 4, kind: input, shape index: {}]   ;;  %s1786_s6 = inlined_call_operand.vmem [shape: f32[32,128], index: 6, kind: input, shape index: {}]   ;;  %s1787_s5 = inlined_call_operand.vmem [shape: f32[8,32], index: 5, kind: input, shape index: {}]   ;;  %s1788_s7 = inlined_call_operand.vmem [shape: f32[1,128], index: 7, kind: input, shape index: {}]   ;;  %s1789_s8 = inlined_call_operand.vmem [shape: f32[8,128], index: 8, kind: output, shape index: {}]  }
   0x1   :  { %v33_v0 = vld [vmem:[%s1781_s1] sm:$0xff]  ;;  %v34_v1 = vld [vmem:[%s1781_s1 + $0x8] sm:$0xff]  ;;  %v35_v2 = vld [vmem:[%s1781_s1 + $0x10] sm:$0xff] }
   0x2   :  { %v1172_v3 = vpack.c.bf16 %v34_v1, %v33_v0  ;;  %v36_v4 = vld [vmem:[%s1781_s1 + $0x18] sm:$0xff]  ;;  %v29_v5 = vld [vmem:[%s1782_s0] sm:$0xff]  ;;  %v1476_v7 = vld [vmem:[%s1783_s3 + $0x10] sm:$0xff]  ;;  %s1406_s1 = smov 32  }
   0x3   :  { %v1176_v6 = vpack.c.bf16 %v36_v4, %v35_v2  ;;  %1030 = vmatprep.mubr.msk.f32.mxu0 %vm44_vm0, %v29_v5  ;;  %v1481_v8 = vld [vmem:[%s1783_s3] sm:$0xff]  ;;  %178 = vrot.lane.b32.xlu1 %v1476_v7, %s1406_s1  ;;  %v1490_v9 = vld [vmem:[%s1783_s3 + $0x18] sm:$0xff]  ;;  %v1495_v10 = vld [vmem:[%s1783_s3 + $0x8] sm:$0xff] }
   0x4   :  { %1173 = vmatprep.subr.bf16.mxu0 %v1172_v3  ;;  %174 = vrot.lane.b32.xlu0 %v1481_v8, %s1406_s1  ;;  %v30_v11 = vld [vmem:[%s1782_s0 + $0x8] sm:$0xff]  ;;  %v31_v12 = vld [vmem:[%s1782_s0 + $0x10] sm:$0xff]  ;;  %v1515_v14 = vld [vmem:[%s1783_s3 + $0x20] sm:$0xff] }
   0x5   :  { %1175 = vmatpush3.bf16.msra.mxu0 %v1172_v3  ;;  %v1510_v13 = vld [vmem:[%s1783_s3 + $0x28] sm:$0xff]  ;;  %v32_v15 = vld [vmem:[%s1782_s0 + $0x18] sm:$0xff]  ;;  %v1534_v17 = vld [vmem:[%s1783_s3 + $0x30] sm:$0xff] }
   0x6   :  { %1177 = vmatprep.subr.bf16.mxu0 %v1176_v6  ;;  %v1529_v16 = vld [vmem:[%s1783_s3 + $0x38] sm:$0xff]  ;;  %v1544_v18 = vld [vmem:[%s1783_s3 + $0x48] sm:$0xff]  ;;  %v1549_v19 = vld [vmem:[%s1783_s3 + $0x40] sm:$0xff] }
   0x7   :  { %180 = vrot.lane.b32.xlu1 %v1490_v9, %s1406_s1  ;;  %v1558_v20 = vld [vmem:[%s1783_s3 + $0x58] sm:$0xff]  ;;  %v1563_v21 = vld [vmem:[%s1783_s3 + $0x50] sm:$0xff]  ;;  %v1572_v22 = vld [vmem:[%s1783_s3 + $0x68] sm:$0xff] }
   0x8   :  { %176 = vrot.lane.b32.xlu0 %v1495_v10, %s1406_s1  ;;  %v1577_v23 = vld [vmem:[%s1783_s3 + $0x60] sm:$0xff]  ;;  %v1586_v24 = vld [vmem:[%s1783_s3 + $0x78] sm:$0xff]  ;;  %v1591_v25 = vld [vmem:[%s1783_s3 + $0x70] sm:$0xff]  ;;  %s1408_s3 = smov 64  }
   0x9   :  { %1179 = vmatpush3.bf16.msra.mxu0 %v1176_v6  ;;  %v916_v35 = vld [vmem:[%s1784_s2] ss:$0 sm:$0xff]  ;;  %s1407_s2 = smov 96   ;;  %vm1674_vm1 = vmpackc.low %vm44_vm0, %vm44_vm0 }
   0xb   :  { %184 = vrot.lane.b32.xlu1 %v1510_v13, %s1406_s1 }
   0xc   :  { %1031 = vmatmul.mubr.msk.f32.vlgmr.msra.gmra.mrb[0].mxu0 %vm44_vm0, %v30_v11  ;;  %182 = vrot.lane.b32.xlu0 %v1515_v14, %s1406_s1 }
   0xd   :  { %1033 = vmatprep.mubr.msk.f32.mxu0 %vm44_vm0, %v31_v12 }
   0xf   :  { %188 = vrot.lane.b32.xlu1 %v1529_v16, %s1406_s1 }
  0x10   :  { %1034 = vmatmul.mubr.msk.f32.gmra.mrb[2].mxu0 %vm44_vm0, %v32_v15  ;;  %186 = vrot.lane.b32.xlu0 %v1534_v17, %s1406_s1 }
  0x13   :  { %192 = vrot.lane.b32.xlu1 %v1544_v18, %s1406_s1 }
  0x14   :  { %190 = vrot.lane.b32.xlu0 %v1549_v19, %s1406_s1 }
  0x17   :  { %196 = vrot.lane.b32.xlu1 %v1558_v20, %s1406_s1 }
  0x18   :  { %194 = vrot.lane.b32.xlu0 %v1563_v21, %s1406_s1 }
  0x1b   :  { %200 = vrot.lane.b32.xlu1 %v1572_v22, %s1406_s1 }
  0x1c   :  { %198 = vrot.lane.b32.xlu0 %v1577_v23, %s1406_s1 }
  0x1f   :  { %204 = vrot.lane.b32.xlu1 %v1586_v24, %s1406_s1 }
  0x20   :  { %202 = vrot.lane.b32.xlu0 %v1591_v25, %s1406_s1 }
  0x75   :  { %v179_v26 = vpop.permute.xlu1 %178 }
  0x76   :  { %v175_v27 = vpop.permute.xlu0 %174 }
  0x79   :  { %v181_v28 = vpop.permute.xlu1 %180 }
  0x7a   :  { %v177_v29 = vpop.permute.xlu0 %176 }
  0x7d   :  { %v185_v30 = vpop.permute.xlu1 %184 }
  0x7e   :  { %v183_v31 = vpop.permute.xlu0 %182 }
  0x81   :  { %v189_v32 = vpop.permute.xlu1 %188 }
  0x82   :  { %v187_v33 = vpop.permute.xlu0 %186 }
  0x85   :  { %v193_v34 = vpop.permute.xlu1 %192 }
  0x86   :  { %v191_v36 = vpop.permute.xlu0 %190 }
  0x89   :  { %v197_v42 = vpop.permute.xlu1 %196 }
  0x8a   :  { %v195_v45 = vpop.permute.xlu0 %194 }
  0x8d   :  { %v201_v56 = vpop.permute.xlu1 %200 }
  0x8e   :  { %v199_v61 = vpop.permute.xlu0 %198 }
  0x91   :  { %v205_v4 = vpop.permute.xlu1 %204 }
  0x92   :  { %v203_v5 = vpop.permute.xlu0 %202 }
  0xdf   :  { %v1032_v37 = vpop.f32.mrb[0].mxu0 }
  0xe0   :  { %v1600_v38 = vadd.f32 %v1032_v37, %v916_v35  ;;  %v123_v39 = vpop.f32.mrb[1].mxu0  ;;  %v1256_v37 = vpack.c.bf16 %v1586_v24, %v1591_v25 }
  0xe1   :  { %v1602_v40 = vadd.f32 %v916_v35, %v123_v39 }
  0xe2   :  { %v223_v41 = vmul.f32 %v177_v29, %v1600_v38  ;;  %v227_v51 = vmul.f32 %v185_v30, %v1600_v38  ;;  %v231_v60 = vmul.f32 %v193_v34, %v1600_v38  ;;  %v235_v63 = vmul.f32 %v201_v56, %v1600_v38 }
  0xe3   :  { %v1035_v43 = vpop.f32.mrb[2].mxu0  ;;  %1068 = vmatprep.mubr.msk.f32.mxu1 %vm44_vm0, %v1602_v40  ;;  %v222_v44 = vmul.f32 %v175_v27, %v1602_v40  ;;  %v226_v50 = vmul.f32 %v183_v31, %v1602_v40  ;;  %v230_v59 = vmul.f32 %v191_v36, %v1602_v40  ;;  %v234_v0 = vmul.f32 %v199_v61, %v1602_v40 }
  0xe4   :  { %v1608_v46 = vadd.f32 %v1035_v43, %v916_v35  ;;  %v133_v47 = vpop.f32.mrb[3].mxu0  ;;  %v1228_v27 = vpack.c.bf16 %v1495_v10, %v1481_v8  ;;  %v1236_v29 = vpack.c.bf16 %v1510_v13, %v1515_v14  ;;  %v1240_v30 = vpack.c.bf16 %v1529_v16, %v1534_v17 }
  0xe5   :  { %v1610_v48 = vadd.f32 %v916_v35, %v133_v47  ;;  %v1310_v49 = vpack.i.bf16 %v223_v41, %v222_v44  ;;  %v1320_v58 = vpack.i.bf16 %v227_v51, %v226_v50  ;;  %v1330_v1 = vpack.i.bf16 %v231_v60, %v230_v59 }
  0xe6   :  { %v225_v52 = vmul.f32 %v181_v28, %v1608_v46  ;;  %v229_v55 = vmul.f32 %v189_v32, %v1608_v46  ;;  %v233_v3 = vmul.f32 %v197_v42, %v1608_v46  ;;  %v1340_v6 = vpack.i.bf16 %v235_v63, %v234_v0  ;;  %1229 = vmatprep.subr.bf16.mxu0 %v1228_v27 }
  0xe7   :  { %1311 = vrot.lane.b32.xlu0 %v1310_v49, %s1407_s2  ;;  %v224_v53 = vmul.f32 %v179_v26, %v1610_v48  ;;  %v228_v54 = vmul.f32 %v187_v33, %v1610_v48  ;;  %v232_v2 = vmul.f32 %v195_v45, %v1610_v48  ;;  %v237_v11 = vmul.f32 %v205_v4, %v1608_v46 }
  0xe8   :  { %v236_v12 = vmul.f32 %v203_v5, %v1610_v48  ;;  %v1232_v28 = vpack.c.bf16 %v1490_v9, %v1476_v7  ;;  %1231 = vmatpush3.bf16.msra.mxu0 %v1228_v27  ;;  %v1244_v31 = vpack.c.bf16 %v1544_v18, %v1549_v19 }
  0xe9   :  { %v1315_v57 = vpack.i.bf16 %v225_v52, %v224_v53  ;;  %v1325_v62 = vpack.i.bf16 %v229_v55, %v228_v54  ;;  %v1335_v15 = vpack.i.bf16 %v233_v3, %v232_v2 }
  0xea   :  { %v1345_v26 = vpack.i.bf16 %v237_v11, %v236_v12  ;;  %1233 = vmatprep.subr.bf16.mxu0 %v1232_v28 }
  0xeb   :  { %1316 = vrot.lane.b32.xlu1 %v1315_v57, %s1407_s2  ;;  %1321 = vrot.lane.b32.xlu0 %v1320_v58, %s1407_s2 }
  0xec   :  { %1235 = vmatpush3.bf16.msra.mxu0 %v1232_v28 }
  0xed   :  { %1237 = vmatprep.subr.bf16.mxu0 %v1236_v29 }
  0xef   :  { %1326 = vrot.lane.b32.xlu1 %v1325_v62, %s1407_s2  ;;  %1331 = vrot.lane.b32.xlu0 %v1330_v1, %s1407_s2 }
  0xf0   :  { %1239 = vmatpush3.bf16.msra.mxu0 %v1236_v29 }
  0xf1   :  { %1241 = vmatprep.subr.bf16.mxu0 %v1240_v30 }
  0xf3   :  { %1336 = vrot.lane.b32.xlu1 %v1335_v15, %s1407_s2  ;;  %1341 = vrot.lane.b32.xlu0 %v1340_v6, %s1407_s2 }
  0xf4   :  { %1243 = vmatpush3.bf16.msra.mxu0 %v1240_v30  ;;  %v484_v30 = vld [vmem:[%s1785_s4 + $0x8] sm:$0xff] }
  0xf5   :  { %1245 = vmatprep.subr.bf16.mxu0 %v1244_v31 }
  0xf7   :  { %1346 = vrot.lane.b32.xlu1 %v1345_v26, %s1407_s2  ;;  %238 = vrot.lane.b32.xlu0 %v1481_v8, %s1408_s3  ;;  %v1252_v8 = vpack.c.bf16 %v1572_v22, %v1577_v23 }
  0xf8   :  { %1247 = vmatpush3.bf16.msra.mxu0 %v1244_v31 }
  0xfb   :  { %240 = vrot.lane.b32.xlu1 %v1495_v10, %s1408_s3  ;;  %242 = vrot.lane.b32.xlu0 %v1476_v7, %s1408_s3  ;;  %v1248_v7 = vpack.c.bf16 %v1558_v20, %v1563_v21 }
  0xfd   :  { %1249 = vmatprep.subr.bf16.mxu0 %v1248_v7 }
  0xfe   :  { %1251 = vmatpush3.bf16.msra.mxu0 %v1248_v7 }
  0xff   :  { %244 = vrot.lane.b32.xlu1 %v1490_v9, %s1408_s3  ;;  %246 = vrot.lane.b32.xlu0 %v1515_v14, %s1408_s3 }
 0x100   :  { %1253 = vmatprep.subr.bf16.mxu0 %v1252_v8 }
 0x102   :  { %1255 = vmatpush3.bf16.msra.mxu0 %v1252_v8  ;;  %v483_v8 = vld [vmem:[%s1785_s4] sm:$0xff] }
 0x103   :  { %248 = vrot.lane.b32.xlu1 %v1510_v13, %s1408_s3  ;;  %250 = vrot.lane.b32.xlu0 %v1534_v17, %s1408_s3 }
 0x104   :  { %1257 = vmatprep.subr.bf16.mxu0 %v1256_v37 }
 0x106   :  { %1259 = vmatpush3.bf16.msra.mxu0 %v1256_v37 }
 0x107   :  { %252 = vrot.lane.b32.xlu1 %v1529_v16, %s1408_s3  ;;  %254 = vrot.lane.b32.xlu0 %v1549_v19, %s1408_s3 }
 0x10b   :  { %256 = vrot.lane.b32.xlu1 %v1544_v18, %s1408_s3  ;;  %258 = vrot.lane.b32.xlu0 %v1563_v21, %s1408_s3 }
 0x10f   :  { %260 = vrot.lane.b32.xlu1 %v1558_v20, %s1408_s3  ;;  %262 = vrot.lane.b32.xlu0 %v1577_v23, %s1408_s3 }
 0x113   :  { %264 = vrot.lane.b32.xlu1 %v1572_v22, %s1408_s3  ;;  %266 = vrot.lane.b32.xlu0 %v1591_v25, %s1408_s3 }
 0x117   :  { %268 = vrot.lane.b32.xlu1 %v1586_v24, %s1408_s3 }
 0x159   :  { %v1312_v9 = vpop.permute.xlu0 %1311 }
 0x15a   :  { %v1314_v10 = vunpack.i.h.bf16 %v1312_v9  ;;  %v1313_v13 = vunpack.i.l.bf16 %v1312_v9 }
 0x15c   :  { %v1180_v16 = vpack.c.bf16 %v1314_v10, %v1313_v13 }
 0x15d   :  { %v1317_v17 = vpop.permute.xlu1 %1316  ;;  %v1322_v18 = vpop.permute.xlu0 %1321 }
 0x15e   :  { %v1319_v19 = vunpack.i.h.bf16 %v1317_v17  ;;  %v1318_v20 = vunpack.i.l.bf16 %v1317_v17  ;;  %1182 = vmatprep.subr.msk.bf16.mxu1 %vm1674_vm1, %v1180_v16  ;;  %v1324_v32 = vunpack.i.h.bf16 %v1322_v18  ;;  %v1323_v33 = vunpack.i.l.bf16 %v1322_v18 }
 0x15f   :  { %1185 = vmatpush3.bf16.xpose.msk.msra.mxu1 %vm1674_vm1, %v1180_v16 }
 0x160   :  { %v1186_v21 = vpack.c.bf16 %v1319_v19, %v1318_v20  ;;  %v1192_v36 = vpack.c.bf16 %v1324_v32, %v1323_v33 }
 0x161   :  { %v1327_v22 = vpop.permute.xlu1 %1326  ;;  %v1332_v23 = vpop.permute.xlu0 %1331 }
 0x162   :  { %1188 = vmatprep.subr.msk.bf16.mxu1 %vm1674_vm1, %v1186_v21  ;;  %v1329_v42 = vunpack.i.h.bf16 %v1327_v22  ;;  %v1328_v43 = vunpack.i.l.bf16 %v1327_v22  ;;  %v1334_v51 = vunpack.i.h.bf16 %v1332_v23  ;;  %v1333_v52 = vunpack.i.l.bf16 %v1332_v23 }
 0x164   :  { %v1198_v45 = vpack.c.bf16 %v1329_v42, %v1328_v43  ;;  %v1204_v56 = vpack.c.bf16 %v1334_v51, %v1333_v52 }
 0x165   :  { %v1337_v34 = vpop.permute.xlu1 %1336  ;;  %v1342_v35 = vpop.permute.xlu0 %1341 }
 0x166   :  { %v1339_v57 = vunpack.i.h.bf16 %v1337_v34  ;;  %v1338_v58 = vunpack.i.l.bf16 %v1337_v34  ;;  %v1344_v60 = vunpack.i.h.bf16 %v1342_v35  ;;  %v1343_v61 = vunpack.i.l.bf16 %v1342_v35 }
 0x167   :  { %1191 = vmatpush3.bf16.xpose.msk.msra.mxu1 %vm1674_vm1, %v1186_v21 }
 0x168   :  { %1194 = vmatprep.subr.msk.bf16.mxu1 %vm1674_vm1, %v1192_v36  ;;  %v1210_v59 = vpack.c.bf16 %v1339_v57, %v1338_v58  ;;  %v1216_v62 = vpack.c.bf16 %v1344_v60, %v1343_v61 }
 0x169   :  { %v1347_v39 = vpop.permute.xlu1 %1346  ;;  %v239_v41 = vpop.permute.xlu0 %238 }
 0x16a   :  { %v286_v47 = vmul.f32 %v239_v41, %v1602_v40  ;;  %v1349_v63 = vunpack.i.h.bf16 %v1347_v39  ;;  %v1348_v0 = vunpack.i.l.bf16 %v1347_v39 }
 0x16c   :  { %v1222_v1 = vpack.c.bf16 %v1349_v63, %v1348_v0 }
 0x16d   :  { %v241_v44 = vpop.permute.xlu1 %240  ;;  %v243_v50 = vpop.permute.xlu0 %242 }
 0x16e   :  { %v287_v49 = vmul.f32 %v241_v44, %v1600_v38  ;;  %v288_v53 = vmul.f32 %v243_v50, %v1610_v48  ;;  %v486_v50 = vld [vmem:[%s1785_s4 + $0x18] sm:$0xff] }
 0x16f   :  { %1197 = vmatpush3.bf16.xpose.msk.msra.mxu1 %vm1674_vm1, %v1192_v36 }
 0x170   :  { %v1350_v24 = vpack.i.bf16 %v287_v49, %v286_v47  ;;  %1200 = vmatprep.subr.msk.bf16.mxu1 %vm1674_vm1, %v1198_v45 }
 0x171   :  { %v245_v25 = vpop.permute.xlu1 %244  ;;  %v247_v28 = vpop.permute.xlu0 %246 }
 0x172   :  { %v289_v54 = vmul.f32 %v245_v25, %v1608_v46  ;;  %1351 = vrot.lane.b32.xlu1 %v1350_v24, %s1408_s3  ;;  %v290_v21 = vmul.f32 %v247_v28, %v1602_v40 }
 0x174   :  { %v1355_v55 = vpack.i.bf16 %v289_v54, %v288_v53 }
 0x175   :  { %v249_v2 = vpop.permute.xlu1 %248  ;;  %v251_v10 = vpop.permute.xlu0 %250 }
 0x176   :  { %1356 = vrot.lane.b32.xlu0 %v1355_v55, %s1408_s3  ;;  %v291_v20 = vmul.f32 %v249_v2, %v1600_v38  ;;  %v292_v33 = vmul.f32 %v251_v10, %v1610_v48 }
 0x177   :  { %1203 = vmatpush3.bf16.xpose.msk.msra.mxu1 %vm1674_vm1, %v1198_v45 }
 0x178   :  { %1206 = vmatprep.subr.msk.bf16.mxu1 %vm1674_vm1, %v1204_v56  ;;  %v1360_v22 = vpack.i.bf16 %v291_v20, %v290_v21 }
 0x179   :  { %v253_v3 = vpop.permute.xlu1 %252  ;;  %v255_v18 = vpop.permute.xlu0 %254 }
 0x17a   :  { %v293_v23 = vmul.f32 %v253_v3, %v1608_v46  ;;  %v294_v36 = vmul.f32 %v255_v18, %v1602_v40 }
 0x17c   :  { %v1365_v35 = vpack.i.bf16 %v293_v23, %v292_v33 }
 0x17d   :  { %v257_v4 = vpop.permute.xlu1 %256  ;;  %v259_v19 = vpop.permute.xlu0 %258 }
 0x17e   :  { %v295_v34 = vmul.f32 %v257_v4, %v1600_v38  ;;  %v296_v41 = vmul.f32 %v259_v19, %v1610_v48 }
 0x17f   :  { %1209 = vmatpush3.bf16.xpose.msk.msra.mxu1 %vm1674_vm1, %v1204_v56 }
 0x180   :  { %1212 = vmatprep.subr.msk.bf16.mxu1 %vm1674_vm1, %v1210_v59  ;;  %v1370_v39 = vpack.i.bf16 %v295_v34, %v294_v36  ;;  %v1409_v34 = vmov 0.0|0.0   ;;  %v827_v36 = vld [vmem:[%s1786_s6] sm:$0xff] }
 0x181   :  { %v261_v5 = vpop.permute.xlu1 %260  ;;  %v263_v32 = vpop.permute.xlu0 %262 }
 0x182   :  { %v297_v37 = vmul.f32 %v261_v5, %v1608_v46  ;;  %v298_v52 = vmul.f32 %v263_v32, %v1602_v40 }
 0x184   :  { %v1375_v43 = vpack.i.bf16 %v297_v37, %v296_v41  ;;  %v828_v37 = vld [vmem:[%s1786_s6 + $0x8] sm:$0xff] }
 0x185   :  { %v265_v6 = vpop.permute.xlu1 %264  ;;  %v267_v42 = vpop.permute.xlu0 %266  ;;  %v1299_v41 = vpack.c.bf16 %v828_v37, %v827_v36 }
 0x186   :  { %v300_v45 = vmul.f32 %v267_v42, %v1610_v48  ;;  %v830_v42 = vld [vmem:[%s1786_s6 + $0x18] sm:$0xff] }
 0x187   :  { %1215 = vmatpush3.bf16.xpose.msk.msra.mxu1 %vm1674_vm1, %v1210_v59 }
 0x188   :  { %1218 = vmatprep.subr.msk.bf16.mxu1 %vm1674_vm1, %v1216_v62 }
 0x189   :  { %v269_v11 = vpop.permute.xlu1 %268 }
 0x18a   :  { %v301_v44 = vmul.f32 %v269_v11, %v1608_v46 }
 0x18c   :  { %v1385_v47 = vpack.i.bf16 %v301_v44, %v300_v45 }
 0x18f   :  { %1221 = vmatpush3.bf16.xpose.msk.msra.mxu1 %vm1674_vm1, %v1216_v62 }
 0x190   :  { %1224 = vmatprep.subr.msk.bf16.mxu1 %vm1674_vm1, %v1222_v1 }
 0x197   :  { %1227 = vmatpush3.bf16.xpose.msk.msra.mxu1 %vm1674_vm1, %v1222_v1 }
 0x198   :  { %1292 = vmatprep.subr.bf16.mxu1 %v1409_v34 }
 0x19e   :  { %1069 = vmatmul.mubr.msk.f32.vlgmr.msra.gmra.mrb[0].mxu1 %vm44_vm0, %v1600_v38 }
 0x19f   :  { %1071 = vmatprep.mubr.msk.f32.mxu1 %vm44_vm0, %v1610_v48  ;;  %v299_v48 = vmul.f32 %v265_v6, %v1600_v38 }
 0x1a1   :  { %v1380_v53 = vpack.i.bf16 %v299_v48, %v298_v52 }
 0x1a2   :  { %1072 = vmatmul.mubr.msk.f32.gmra.mrb[2].mxu1 %vm44_vm0, %v1608_v46  ;;  %v485_v46 = vld [vmem:[%s1785_s4 + $0x10] sm:$0xff] }
 0x1e4   :  { %v1352_v12 = vpop.permute.xlu1 %1351 }
 0x1e5   :  { %v1354_v15 = vunpack.i.h.bf16 %v1352_v12  ;;  %v1353_v26 = vunpack.i.l.bf16 %v1352_v12 }
 0x1e7   :  { %v1724_v27 = vpack.c.bf16 %v1354_v15, %v1353_v26 }
 0x1e8   :  { %v1357_v54 = vpop.permute.xlu0 %1356 }
 0x1e9   :  { %1261 = vmatprep.subr.bf16.mxu0 %v1724_v27  ;;  %v1359_v62 = vunpack.i.h.bf16 %v1357_v54  ;;  %v1358_v63 = vunpack.i.l.bf16 %v1357_v54 }
 0x1eb   :  { %v1264_v38 = vpack.c.bf16 %v1359_v62, %v1358_v63  ;;  %v942_v63 = vld [vmem:[%s1788_s7] ss:$0 sm:$0xff] }
 0x271   :  { %v1070_v29 = vpop.f32.mrb[0].mxu1 }
 0x272   :  { %v480_v31 = vmul.f32 0.35355338, %v1070_v29  ;;  %v460_v7 = vpop.f32.mrb[1].mxu1 }
 0x273   :  { %v479_v9 = vmul.f32 0.35355338, %v460_v7 }
 0x274   :  { %v488_v13 = vadd.f32 %v484_v30, %v480_v31 }
 0x275   :  { %v1073_v14 = vpop.f32.mrb[2].mxu1  ;;  %v487_v16 = vadd.f32 %v483_v8, %v479_v9 }
 0x276   :  { %493 = vmax.xlane.f32.xlu1 %v488_v13  ;;  %v470_v17 = vpop.f32.mrb[3].mxu1  ;;  %v482_v49 = vmul.f32 0.35355338, %v1073_v14 }
 0x277   :  { %491 = vmax.xlane.f32.xlu0 %v487_v16  ;;  %v481_v24 = vmul.f32 0.35355338, %v470_v17 }
 0x278   :  { %v490_v25 = vadd.f32 %v486_v50, %v482_v49 }
 0x279   :  { %v489_v51 = vadd.f32 %v485_v46, %v481_v24 }
 0x287   :  { %1361 = vrot.lane.b32.xlu1 %v1360_v22, %s1408_s3 }
 0x28b   :  { %1366 = vrot.lane.b32.xlu1 %v1365_v35, %s1408_s3  ;;  %v1411_v35 = vmov 0.0  }
 0x28c   :  { %1158 = vmatprep.mubr.msk.f32.mxu1 %vm1410_vm2, %v1411_v35 }
 0x28d   :  { %1371 = vrot.lane.b32.xlu0 %v1370_v39, %s1408_s3  ;;  %v829_v39 = vld [vmem:[%s1786_s6 + $0x10] sm:$0xff] }
 0x28f   :  { %1376 = vrot.lane.b32.xlu1 %v1375_v43, %s1408_s3  ;;  %v1302_v43 = vpack.c.bf16 %v830_v42, %v829_v39 }
 0x293   :  { %1386 = vrot.lane.b32.xlu1 %v1385_v47, %s1408_s3 }
 0x2ac   :  { %497 = vmax.xlane.f32.xlu0 %v490_v25 }
 0x2b0   :  { %495 = vmax.xlane.f32.xlu0 %v489_v51 }
 0x2c6   :  { %1381 = vrot.lane.b32.xlu0 %v1380_v53, %s1408_s3 }
 0x303   :  { %v494_v55 = vpop.xlane.xlu1 %493 }
 0x304   :  { %v500_v56 = vsub.f32 %v488_v13, %v494_v55  ;;  %v492_v57 = vpop.xlane.xlu0 %491 }
 0x305   :  { %v499_v58 = vsub.f32 %v487_v16, %v492_v57 }
 0x306   :  { %v505_v59 = vmul.f32 1.442695, %v500_v56 }
 0x307   :  { %v503_v60 = vmul.f32 1.442695, %v499_v58  ;;  %v1362_v61 = vpop.permute.xlu1 %1361 }
 0x308   :  { %v1364_v40 = vunpack.i.h.bf16 %v1362_v61  ;;  %v1363_v2 = vunpack.i.l.bf16 %v1362_v61  ;;  %v1372_v11 = vpop.permute.xlu0 %1371 }
 0x309   :  { %1390 = vpow2.f32 %v503_v60  ;;  %v1374_v12 = vunpack.i.h.bf16 %v1372_v11  ;;  %v1373_v15 = vunpack.i.l.bf16 %v1372_v11  ;;  %v753_v60 = vld [vmem:[%s1787_s5] sm:$0xff] }
 0x30a   :  { %1392 = vpow2.f32 %v505_v59  ;;  %v1268_v4 = vpack.c.bf16 %v1364_v40, %v1363_v2 }
 0x30b   :  { %v1367_v3 = vpop.permute.xlu1 %1366  ;;  %v1276_v29 = vpack.c.bf16 %v1374_v12, %v1373_v15 }
 0x30c   :  { %v1369_v5 = vunpack.i.h.bf16 %v1367_v3  ;;  %v1368_v6 = vunpack.i.l.bf16 %v1367_v3 }
 0x30e   :  { %v1272_v26 = vpack.c.bf16 %v1369_v5, %v1368_v6 }
 0x30f   :  { %v1377_v28 = vpop.permute.xlu1 %1376 }
 0x310   :  { %v1379_v30 = vunpack.i.h.bf16 %v1377_v28  ;;  %v1378_v31 = vunpack.i.l.bf16 %v1377_v28 }
 0x312   :  { %v1280_v7 = vpack.c.bf16 %v1379_v30, %v1378_v31 }
 0x313   :  { %v1391_v0 = vpop.eup %1390  ;;  %v1387_v10 = vpop.permute.xlu1 %1386 }
 0x314   :  { %v1393_v1 = vpop.eup %1392  ;;  %1106 = vmatprep.mubr.f32.mxu0 %v1391_v0  ;;  %v1389_v17 = vunpack.i.h.bf16 %v1387_v10  ;;  %v1388_v19 = vunpack.i.l.bf16 %v1387_v10 }
 0x315   :  { %1107 = vmatmul.mubr.f32.vlgmr.msra.gmra.mrb[4].mxu0 %v1393_v1 }
 0x316   :  { %1263 = vmatpush3.bf16.msra.mxu0 %v1724_v27  ;;  %v1288_v23 = vpack.c.bf16 %v1389_v17, %v1388_v19 }
 0x317   :  { %1265 = vmatprep.subr.bf16.mxu0 %v1264_v38 }
 0x31a   :  { %1267 = vmatpush3.bf16.msra.mxu0 %v1264_v38 }
 0x31b   :  { %1269 = vmatprep.subr.bf16.mxu0 %v1268_v4 }
 0x31e   :  { %1271 = vmatpush3.bf16.msra.mxu0 %v1268_v4 }
 0x31f   :  { %1273 = vmatprep.subr.bf16.mxu0 %v1272_v26 }
 0x322   :  { %1275 = vmatpush3.bf16.msra.mxu0 %v1272_v26 }
 0x323   :  { %1277 = vmatprep.subr.bf16.mxu0 %v1276_v29 }
 0x326   :  { %1279 = vmatpush3.bf16.msra.mxu0 %v1276_v29 }
 0x327   :  { %1281 = vmatprep.subr.bf16.mxu0 %v1280_v7 }
 0x32a   :  { %1283 = vmatpush3.bf16.msra.mxu0 %v1280_v7 }
 0x339   :  { %v498_v27 = vpop.xlane.xlu0 %497 }
 0x33a   :  { %v502_v8 = vsub.f32 %v490_v25, %v498_v27 }
 0x33c   :  { %v509_v14 = vmul.f32 1.442695, %v502_v8 }
 0x33d   :  { %v496_v9 = vpop.xlane.xlu0 %495 }
 0x33e   :  { %v501_v13 = vsub.f32 %v489_v51, %v496_v9 }
 0x340   :  { %v507_v16 = vmul.f32 1.442695, %v501_v13 }
 0x341   :  { %v1382_v18 = vpop.permute.xlu0 %1381 }
 0x342   :  { %1394 = vpow2.f32 %v507_v16  ;;  %v1384_v20 = vunpack.i.h.bf16 %v1382_v18  ;;  %v1383_v21 = vunpack.i.l.bf16 %v1382_v18 }
 0x343   :  { %1396 = vpow2.f32 %v509_v14 }
 0x344   :  { %v1284_v22 = vpack.c.bf16 %v1384_v20, %v1383_v21 }
 0x346   :  { %1285 = vmatprep.subr.bf16.mxu0 %v1284_v22 }
 0x347   :  { %1287 = vmatpush3.bf16.msra.mxu0 %v1284_v22 }
 0x348   :  { %1289 = vmatprep.subr.bf16.mxu0 %v1288_v23 }
 0x34b   :  { %1291 = vmatpush3.bf16.msra.mxu0 %v1288_v23 }
 0x34c   :  { %v1395_v32 = vpop.eup %1394  ;;  %1298 = vmatprep.subr.bf16.mxu0 %v1409_v34 }
 0x34d   :  { %v1397_v33 = vpop.eup %1396  ;;  %1109 = vmatprep.mubr.f32.mxu0 %v1395_v32 }
 0x34e   :  { %1110 = vmatmul.mubr.f32.gmra.mrb[6].mxu0 %v1397_v33 }
 0x34f   :  { %1144 = vmatprep.mubr.f32.mxu0 %v1391_v0 }
 0x352   :  { %1145 = vmatmul.mubr.f32.vlgmr.msra.gmra.mrb[8].mxu0 %v1393_v1 }
 0x353   :  { %1147 = vmatprep.mubr.f32.mxu0 %v1395_v32  ;;  %1300 = vmatpush3.bf16.msra.mxu0 %v1299_v41 }
 0x354   :  { %1301 = vmatprep.subr.bf16.mxu0 %v1409_v34 }
 0x356   :  { %1148 = vmatmul.mubr.f32.gmra.mrb[10].mxu0 %v1397_v33 }
 0x357   :  { %1169 = vmatprep.mubr.msk.f32.mxu0 %vm1410_vm2, %v1411_v35  ;;  %1303 = vmatpush3.bf16.msra.mxu0 %v1302_v43 }
 0x3e8   :  { %v1108_v44 = vpop.f32.mrb[4].mxu0 }
 0x3e9   :  { %v577_v45 = vpop.f32.mrb[5].mxu0  ;;  %1398 = vrcp.f32 %v1108_v44 }
 0x3ea   :  { %1400 = vrcp.f32 %v577_v45 }
 0x3f3   :  { %v1399_v50 = vpop.eup %1398 }
 0x3f4   :  { %v1401_v25 = vpop.eup %1400 }
 0x421   :  { %v1111_v47 = vpop.f32.mrb[6].mxu0 }
 0x422   :  { %1402 = vrcp.f32 %v1111_v47  ;;  %v587_v49 = vpop.f32.mrb[7].mxu0 }
 0x423   :  { %1404 = vrcp.f32 %v587_v49 }
 0x425   :  { %v1146_v24 = vpop.f32.mrb[8].mxu0 }
 0x426   :  { %v750_v46 = vmul.f32 %v1399_v50, %v1146_v24  ;;  %v726_v51 = vpop.f32.mrb[9].mxu0 }
 0x427   :  { %v749_v48 = vmul.f32 %v1401_v25, %v726_v51 }
 0x429   :  { %v1293_v52 = vpack.c.bf16 %v750_v46, %v749_v48  ;;  %v1149_v53 = vpop.f32.mrb[10].mxu0 }
 0x42a   :  { %v736_v54 = vpop.f32.mrb[11].mxu0 }
 0x42b   :  { %1294 = vmatpush3.bf16.msra.mxu1 %v1293_v52 }
 0x42c   :  { %v1403_v55 = vpop.eup %1402  ;;  %1295 = vmatprep.subr.bf16.mxu1 %v1409_v34 }
 0x42d   :  { %v1405_v56 = vpop.eup %1404  ;;  %v752_v57 = vmul.f32 %v1403_v55, %v1149_v53 }
 0x42e   :  { %v751_v58 = vmul.f32 %v1405_v56, %v736_v54 }
 0x430   :  { %v1296_v59 = vpack.c.bf16 %v752_v57, %v751_v58 }
 0x432   :  { %1297 = vmatpush3.bf16.msra.mxu1 %v1296_v59 }
 0x435   :  { %1159 = vmatmul.mubr.msk.f32.vlgmr.msra.gmra.mrb[4].mxu1 %vm44_vm0, %v753_v60 }
 0x508   :  { %v823_v61 = vpop.f32.mrb[4].mxu1 }
 0x509   :  { %v1160_v62 = vpop.f32.mrb[5].mxu1  ;;  %1170 = vmatmul.mubr.msk.f32.vlgmr.msra.gmra.mrb[12].mxu0 %vm44_vm0, %v823_v61 }
 0x5dc   :  { %v907_v0 = vpop.f32.mrb[12].mxu0 }
 0x5dd   :  { %v908_v1 = vadd.f32 %v942_v63, %v907_v0  ;;  %v1171_v38 = vpop.f32.mrb[13].mxu0 }
 0x5df   :  { %911 = vst [vmem:[%s1789_s8] sm:$0xff] %v908_v1 }

</bundles_post_ra>
